<compile_context>
chip_gen: v7x
topology: tpu7x:2x2x1
jax: 0.10.0
libtpu: 0.0.40
codegen_flags: <defaults>
</compile_context>

<pallas_src>
import math
from functools import partial

import jax
import jax.numpy as jnp
from jax import lax
from jax.experimental import pallas as pl
from jax.experimental.pallas import tpu as pltpu


def _round_up(x: int, m: int) -> int:
    return (x + m - 1) // m * m


def _sublane(dtype) -> int:
    # sublane packing granularity for the second-to-last dim
    return {4: 8, 2: 16, 1: 32}.get(jnp.dtype(dtype).itemsize, 8)


# --------------------------------------------------------------------------
# Kernel bodies
# --------------------------------------------------------------------------

def _kernel_single_k(x_ref, w_ref, b_ref, o_ref, *,
                     scale_eff, use_act, neg_slope):
    """K fits in one tile: no accumulator scratch, no pl.when branches."""
    y = lax.dot_general(
        x_ref[...], w_ref[...],
        dimension_numbers=(((1,), (1,)), ((), ())),   # NT contraction on MXU
        preferred_element_type=jnp.float32)
    y = y * scale_eff + b_ref[...].astype(jnp.float32)
    if use_act:
        y = jnp.where(y >= 0.0, y, neg_slope * y)
    o_ref[...] = y.astype(o_ref.dtype)


def _kernel_multi_k(x_ref, w_ref, b_ref, o_ref, acc_ref, *,
                    scale_eff, use_act, neg_slope):
    """K axis (grid dim 2) is the reduction; f32 accumulator in VMEM."""
    k = pl.program_id(2)

    p = lax.dot_general(
        x_ref[...], w_ref[...],
        dimension_numbers=(((1,), (1,)), ((), ())),
        preferred_element_type=jnp.float32)

    # First K step: store directly (no zero-fill + read-modify-write).
    @pl.when(k == 0)
    def _():
        acc_ref[...] = p

    @pl.when(k != 0)
    def _():
        acc_ref[...] += p

    @pl.when(k == pl.num_programs(2) - 1)
    def _():
        # scale_eff folds equalized-lr scale and (if active) the sqrt(2) gain;
        # b_ref already holds bias * lr_mul * gain.
        y = acc_ref[...] * scale_eff + b_ref[...].astype(jnp.float32)
        if use_act:
            y = jnp.where(y >= 0.0, y, neg_slope * y)
        o_ref[...] = y.astype(o_ref.dtype)


# --------------------------------------------------------------------------
# Parameter preparation (do ONCE per parameter set; results are reusable)
# --------------------------------------------------------------------------

def prepare_equal_linear(weight, bias, *, scale, lr_mul, activation=None,
                         negative_slope=0.2, act_scale=2.0 ** 0.5,
                         compute_dtype=None, tn=None, tk=None):
    """Cast / pad / pre-scale the parameters and pick N/K tile sizes."""
    out_dim, in_dim = weight.shape
    use_act = bool(activation)
    if use_act:
        # Folding act_scale before leaky_relu relies on positive homogeneity.
        assert act_scale > 0.0, "act_scale must be positive for fused folding"
    gain = float(act_scale) if use_act else 1.0

    cdtype = jnp.dtype(compute_dtype) if compute_dtype is not None else weight.dtype

    K128 = _round_up(in_dim, 128)
    N128 = _round_up(out_dim, 128)

    # tk: largest tile (cap 2048) that divides the 128-aligned K extent, so the
    # K grid is as shallow as possible (usually 1) with no extra K padding.
    if tk is None:
        if K128 <= 2048:
            tk = K128
        else:
            tk = 128
            for c in range(2048, 127, -128):
                if K128 % c == 0:
                    tk = c
                    break
    tk = _round_up(tk, 128)

    # tn: cap 512, minimise pad blow-up.
    if tn is None:
        if N128 <= 512:
            tn = N128
        else:
            best = None
            for c in range(512, 127, -128):
                waste = _round_up(N128, c) - N128
                if best is None or waste < best[0]:
                    best = (waste, c)
            tn = best[1]
    tn = _round_up(tn, 128)

    Kp = _round_up(K128, tk)
    Np = _round_up(N128, tn)

    w = weight.astype(cdtype)
    if (Np, Kp) != (out_dim, in_dim):
        w = jnp.pad(w, ((0, Np - out_dim), (0, Kp - in_dim)))

    b_eff = (bias.astype(jnp.float32) * (float(lr_mul) * gain)).reshape(1, out_dim)
    if Np != out_dim:
        b_eff = jnp.pad(b_eff, ((0, 0), (0, Np - out_dim)))

    return dict(weight=w, bias=b_eff,
                scale_eff=float(scale) * gain,
                use_act=use_act, negative_slope=float(negative_slope),
                tn=int(tn), tk=int(tk), Np=int(Np), Kp=int(Kp),
                out_dim=int(out_dim), in_dim=int(in_dim),
                compute_dtype=cdtype)


# --------------------------------------------------------------------------
# Per-call forward
# --------------------------------------------------------------------------

def equal_linear(x, params, *, tm=None):
    """x: (B, in_dim).  params: output of prepare_equal_linear.  -> (B, out_dim)."""
    B, in_dim = x.shape
    assert in_dim == params["in_dim"], (in_dim, params["in_dim"])

    cdtype = params["compute_dtype"]
    tn, tk = params["tn"], params["tk"]
    Np, Kp = params["Np"], params["Kp"]
    out_dim = params["out_dim"]
    weight, bias_eff = params["weight"], params["bias"]
    scale_eff = params["scale_eff"]
    use_act = params["use_act"]
    neg = params["negative_slope"]
    out_dtype = x.dtype

    # tm: dtype sublane granularity; never pad a small batch toward 256, and
    # for large B pick 128 vs 256 to minimise padded rows.
    sub = _sublane(cdtype)
    if tm is None:
        b_aligned = _round_up(B, sub)
        if b_aligned <= 256:
            tm = b_aligned
        else:
            tm = 128 if _round_up(B, 128) < _round_up(B, 256) else 256
    else:
        tm = _round_up(tm, sub)
    Bp = _round_up(B, tm)
    m_grid = Bp // tm

    # v7x megacore: ensure >= 2 parallel (M, N) tiles when possible so both
    # TensorCores get work.  Shrink tn only to a 128-multiple that divides Np
    # (no extra padding, weight pre-padding stays valid).
    if m_grid * (Np // tn) < 2:
        units = Np // 128
        for d in range(units // 2, 0, -1):
            if units % d == 0:
                tn = d * 128
                break
    n_grid = Np // tn
    k_grid = Kp // tk

    xk = x.astype(cdtype)
    if (Bp, Kp) != (B, in_dim):
        xk = jnp.pad(xk, ((0, Bp - B), (0, Kp - in_dim)))

    # Cost estimate: weight re-streamed per M tile, x re-streamed per N tile.
    itm = jnp.dtype(cdtype).itemsize
    w_bytes = weight.size * weight.dtype.itemsize * m_grid
    x_bytes = xk.size * itm * n_grid
    b_bytes = bias_eff.size * 4 * m_grid
    o_bytes = Bp * Np * jnp.dtype(out_dtype).itemsize
    cost = pl.CostEstimate(flops=2 * Bp * Kp * Np, transcendentals=0,
                           bytes_accessed=x_bytes + w_bytes + b_bytes + o_bytes)

    # Scoped VMEM limit from the actual double-buffered footprint; explicit so
    # v5e's 16 MiB default doesn't clip buffering, capped at 48 MiB for v7x.
    vmem_need = (2 * (tm * tk + tn * tk) * itm            # x + weight (double-buf)
                 + tm * tn * 4                             # accumulator
                 + 2 * tm * tn * jnp.dtype(out_dtype).itemsize
                 + 2 * 1 * tn * 4)                         # bias
    vmem_limit = int(min(max(32 << 20, 2 * vmem_need), 48 << 20))

    if k_grid == 1:
        kernel = partial(_kernel_single_k, scale_eff=scale_eff,
                         use_act=use_act, neg_slope=neg)
        grid = (m_grid, n_grid)
        in_specs = [
            pl.BlockSpec((tm, tk), lambda i, j: (i, 0)),    # x
            pl.BlockSpec((tn, tk), lambda i, j: (j, 0)),    # weight (NT)
            pl.BlockSpec((1, tn), lambda i, j: (0, j)),     # bias
        ]
        out_specs = pl.BlockSpec((tm, tn), lambda i, j: (i, j))
        scratch = ()
        dims = ("parallel", "parallel")
    else:
        kernel = partial(_kernel_multi_k, scale_eff=scale_eff,
                         use_act=use_act, neg_slope=neg)
        grid = (m_grid, n_grid, k_grid)
        in_specs = [
            pl.BlockSpec((tm, tk), lambda i, j, k: (i, k)),   # x
            pl.BlockSpec((tn, tk), lambda i, j, k: (j, k)),   # weight (NT)
            pl.BlockSpec((1, tn), lambda i, j, k: (0, j)),    # bias
        ]
        out_specs = pl.BlockSpec((tm, tn), lambda i, j, k: (i, j))
        scratch = (pltpu.VMEM((tm, tn), jnp.float32),)
        dims = ("parallel", "parallel", "arbitrary")

    out_padded = pl.pallas_call(
        kernel,
        out_shape=jax.ShapeDtypeStruct((Bp, Np), out_dtype),
        grid_spec=pltpu.PrefetchScalarGridSpec(
            num_scalar_prefetch=0,
            grid=grid,
            in_specs=in_specs,
            out_specs=out_specs,
            scratch_shapes=scratch,
        ),
        compiler_params=pltpu.CompilerParams(
            dimension_semantics=dims,
            vmem_limit_bytes=vmem_limit),
        cost_estimate=cost,
    )(xk, weight, bias_eff)

    return out_padded[:B, :out_dim]


# --------------------------------------------------------------------------
# Reference (pure JAX) and self-test
# --------------------------------------------------------------------------

def equal_linear_ref(x, weight, bias, *, scale, lr_mul, activation=None,
                     negative_slope=0.2, act_scale=2.0 ** 0.5):
    y = x.astype(jnp.float32) @ (weight.astype(jnp.float32) * scale).T \
        + bias.astype(jnp.float32) * lr_mul
    if activation:
        y = act_scale * jnp.where(y >= 0.0, y, negative_slope * y)
    return y


if __name__ == "__main__":
    key = jax.random.PRNGKey(0)
    k_x, k_w, k_x2, k_w2, k_b2 = jax.random.split(key, 5)

    # -------- Case 1 & 2: small EqualLinear (single-K fast path) --------
    batch, in_dim, out_dim = 8, 32, 64
    lr_mul = 1.0
    bias_init = 0.1
    scale = 1.0 / math.sqrt(in_dim) * lr_mul

    weight = jax.random.normal(k_w, (out_dim, in_dim), jnp.float32) / lr_mul
    bias = jnp.full((out_dim,), bias_init, jnp.float32)
    x = jax.random.normal(k_x, (batch, in_dim), jnp.float32)

    p_lin = prepare_equal_linear(weight, bias, scale=scale, lr_mul=lr_mul,
                                 activation=None)
    out_lin = equal_linear(x, p_lin)
    jax.block_until_ready(out_lin)
    ref_lin = equal_linear_ref(x, weight, bias, scale=scale, lr_mul=lr_mul,
                               activation=None)

    p_act = prepare_equal_linear(weight, bias, scale=scale, lr_mul=lr_mul,
                                 activation="fused_lrelu")
    out_act = equal_linear(x, p_act)
    jax.block_until_ready(out_act)
    ref_act = equal_linear_ref(x, weight, bias, scale=scale, lr_mul=lr_mul,
                               activation="fused_lrelu")

    assert out_lin.shape == (batch, out_dim)
    assert out_act.shape == (batch, out_dim)
    assert jnp.allclose(out_lin, ref_lin, atol=1e-4, rtol=1e-4), \
        float(jnp.max(jnp.abs(out_lin - ref_lin)))
    assert jnp.allclose(out_act, ref_act, atol=1e-4, rtol=1e-4), \
        float(jnp.max(jnp.abs(out_act - ref_act)))

    # -------- Case 3: forced multi-K grid (exercise accumulator path) --------
    b3, in3, out3 = 16, 256, 384
    scale3 = 1.0 / math.sqrt(in3) * lr_mul
    w3 = jax.random.normal(k_w2, (out3, in3), jnp.float32) / lr_mul
    b3_param = jax.random.normal(k_b2, (out3,), jnp.float32) * 0.1
    x3 = jax.random.normal(k_x2, (b3, in3), jnp.float32)

    p3 = prepare_equal_linear(w3, b3_param, scale=scale3, lr_mul=lr_mul,
                              activation="fused_lrelu", tk=128)  # K grid = 2
    out3_k = equal_linear(x3, p3)
    jax.block_until_ready(out3_k)
    ref3 = equal_linear_ref(x3, w3, b3_param, scale=scale3, lr_mul=lr_mul,
                            activation="fused_lrelu")
    assert out3_k.shape == (b3, out3)
    assert jnp.allclose(out3_k, ref3, atol=1e-4, rtol=1e-4), \
        float(jnp.max(jnp.abs(out3_k - ref3)))

    # -------- Case 4: bf16 streaming path (f32 accumulation, looser tol) ----
    p_bf16 = prepare_equal_linear(weight, bias, scale=scale, lr_mul=lr_mul,
                                  activation=None, compute_dtype=jnp.bfloat16)
    out_bf16 = equal_linear(x, p_bf16)
    jax.block_until_ready(out_bf16)
    assert out_bf16.shape == (batch, out_dim)
    assert jnp.allclose(out_bf16, ref_lin, atol=5e-2, rtol=5e-2), \
        float(jnp.max(jnp.abs(out_bf16 - ref_lin)))

    print("KERNEL_OK")
</pallas_src>

<mosaic_0001>
module attributes {stable_mosaic.version = 11 : i64} {
  func.func @_kernel_single_k(%arg0: i32, %arg1: i32, %arg2: memref<8x128xf32, #tpu.memory_space<vmem>>, %arg3: memref<128x128xf32, #tpu.memory_space<vmem>>, %arg4: memref<1x128xf32, #tpu.memory_space<vmem>>, %arg5: memref<8x128xf32, #tpu.memory_space<vmem>>) attributes {dimension_semantics = [#tpu.dimension_semantics<parallel>, #tpu.dimension_semantics<parallel>], iteration_bounds = array<i64: 1, 1>, scalar_prefetch = 0 : i64, scratch_operands = 0 : i64, tpu.core_type = #tpu.core_type<tc>, window_params = [{transform_indices = @transform_0, window_bounds = array<i64: 8, 128>}, {transform_indices = @transform_1, window_bounds = array<i64: 128, 128>}, {transform_indices = @transform_2, window_bounds = array<i64: 1, 128>}, {transform_indices = @transform_3, window_bounds = array<i64: 8, 128>}]} {
    %c0 = arith.constant 0 : index
    %c0_0 = arith.constant 0 : index
    %0 = vector.load %arg2[%c0, %c0_0] : memref<8x128xf32, #tpu.memory_space<vmem>>, vector<8x128xf32>
    %c0_1 = arith.constant 0 : index
    %c0_2 = arith.constant 0 : index
    %1 = vector.load %arg3[%c0_1, %c0_2] : memref<128x128xf32, #tpu.memory_space<vmem>>, vector<128x128xf32>
    %cst = arith.constant dense<0.000000e+00> : vector<8x128xf32>
    %2 = tpu.matmul %0, %1, %cst {dimension_numbers = #tpu.dot_dimension_numbers<[1], [1], [0], [0], [0, 0, 1, 0], [], []>} : vector<8x128xf32>, vector<128x128xf32>, vector<8x128xf32> -> vector<8x128xf32>
    %cst_3 = arith.constant 0.176776692 : f32
    %3 = vector.broadcast %cst_3 : f32 to vector<8x128xf32>
    %4 = arith.mulf %2, %3 : vector<8x128xf32>
    %c0_4 = arith.constant 0 : index
    %c0_5 = arith.constant 0 : index
    %5 = vector.load %arg4[%c0_4, %c0_5] : memref<1x128xf32, #tpu.memory_space<vmem>>, vector<1x128xf32>
    %6 = vector.broadcast %5 : vector<1x128xf32> to vector<8x128xf32>
    %7 = arith.addf %4, %6 : vector<8x128xf32>
    %c0_6 = arith.constant 0 : index
    %c0_7 = arith.constant 0 : index
    %8 = vector.load %arg5[%c0_6, %c0_7] : memref<8x128xf32, #tpu.memory_space<vmem>>, vector<8x128xf32>
    tpu.vector_store %arg5[%c0_6, %c0_7], %7 {strides = array<i32>} : memref<8x128xf32, #tpu.memory_space<vmem>>, vector<8x128xf32>,
    return
  }
  func.func @transform_0(%arg0: i32, %arg1: i32) -> (i32, i32) {
    %c0_i32 = arith.constant 0 : i32
    %c0_i32_0 = arith.constant 0 : i32
    return %arg0, %c0_i32 : i32, i32
  }
  func.func @transform_1(%arg0: i32, %arg1: i32) -> (i32, i32) {
    %c0_i32 = arith.constant 0 : i32
    %c0_i32_0 = arith.constant 0 : i32
    return %arg1, %c0_i32 : i32, i32
  }
  func.func @transform_2(%arg0: i32, %arg1: i32) -> (i32, i32) {
    %c0_i32 = arith.constant 0 : i32
    %c0_i32_0 = arith.constant 0 : i32
    return %c0_i32, %arg1 : i32, i32
  }
  func.func @transform_3(%arg0: i32, %arg1: i32) -> (i32, i32) {
    %c0_i32 = arith.constant 0 : i32
    return %arg0, %arg1 : i32, i32
  }
}

</mosaic_0001>

<bundles_post_ra>
// kernel: tpu_custom_call.1
= control target key start
LH: loop header
LB: loop body
LE: loop exit
PB: predicated region body
PF: predicated region fallthrough
CT: control target
= control target key end

     0   :  { %8 = vsyncpa [#allocation3], 0  ;;  %s385_s0 = inlined_call_operand.hbm [shape: f32[8,128], index: 0, kind: input, shape index: {}]   ;;  %s386_s1 = inlined_call_operand.hbm [shape: f32[128,128], index: 1, kind: input, shape index: {}]   ;;  %s387_s2 = inlined_call_operand.vmem [shape: f32[1,128], index: 2, kind: input, shape index: {}]   ;;  %s388_s3 = inlined_call_operand.hbm [shape: f32[8,128], index: 3, kind: output, shape index: {}]  }
   0x1   :  { %9 = vsyncpa [#allocation6], 0 }
   0x2   :  { %10 = vsyncpa [#allocation4], 0  ;;  %s311_s12 = smov [#allocation2]   ;;  %s312_s14 = smov [#allocation5]  }
   0x3   :  { %s17_s13 = sshll.u32 %s311_s12, 4  ;;  %s26_s15 = sshll.u32 %s312_s14, 4  ;;  %s18_s13 = int_to_ptr.vmem [resolvable:$true] %s17_s13  ;;  %s339_s15 = int_to_ptr.vmem [resolvable:$true] %s26_s15 }
   0x4   :  { %s239_s18 = scalar_lea.hbm %s385_s0, 128 }
   0x5   :  { %p240_p0 = scmp.ne.s32.totalorder %s385_s0, %s239_s18  ;;  %p243_p1 = scmp.lt.u32.totalorder %s239_s18, %s385_s0 }
   0x7   :  { %p245_p2 = pnand %p243_p1, %p240_p0 }
   0x9   :  { %248 = shalt.err (!%p245_p2)
}
   0xa   :  { %s249_s23 = scalar_lea.vmem %s18_s13, 128  ;;  %p254_p4 = scmp.lt.s32.totalorder %s18_s13, %s18_s13 }
   0xb   :  { %p250_p3 = scmp.ne.s32.totalorder %s18_s13, %s249_s23  ;;  %p255_p5 = scmp.lt.s32.totalorder %s249_s23, %s249_s23 }
   0xd   :  { %p256_p6 = por %p255_p5, %p254_p4 }
   0xf   :  { %p257_p7 = pnand %p256_p6, %p250_p3 }
  0x11   :  { %260 = shalt.err (!%p257_p7)
}
  0x12   :  { %20 = dma.hbm_to_vmem [thread:$0]  %s385_s0, 128, %s18_s13, [#allocation3]  }
  0x13   :  { %s261_s28 = scalar_lea.hbm %s386_s1, 2048 }
  0x14   :  { %p262_p8 = scmp.ne.s32.totalorder %s386_s1, %s261_s28  ;;  %p265_p9 = scmp.lt.u32.totalorder %s261_s28, %s386_s1 }
  0x16   :  { %p267_p10 = pnand %p265_p9, %p262_p8 }
  0x18   :  { %270 = shalt.err (!%p267_p10)
}
  0x19   :  { %s271_s6 = scalar_lea.vmem %s339_s15, 2048  ;;  %p276_p12 = scmp.lt.s32.totalorder %s339_s15, %s339_s15 }
  0x1a   :  { %p272_p11 = scmp.ne.s32.totalorder %s339_s15, %s271_s6  ;;  %p277_p13 = scmp.lt.s32.totalorder %s271_s6, %s271_s6 }
  0x1c   :  { %p278_p0 = por %p277_p13, %p276_p12 }
  0x1e   :  { %p279_p1 = pnand %p278_p0, %p272_p11 }
  0x20   :  { %282 = shalt.err (!%p279_p1)
}
  0x21   :  { %s313_s0 = smov 128   ;;  %s314_s7 = smov 8  }
  0x22   :  { %32 = dma.hbm_to_vmem [thread:$0]  %s386_s1, 2048, %s339_s15, [#allocation6], %s313_s0, %s313_s0, %s314_s7  }
  0x23   :  { %305 = dma.done.wait [#allocation3], 128  }
  0x24   :  { %306 = vsyncadd [#allocation3], 4294967168 }
  0x25   :  { %307 = dma.done.wait [#allocation6], 2048  }
  0x26   :  { %308 = vsyncadd [#allocation6], 4294965248  ;;  %v315_v0 = vmov 0.0|0.0   ;;  %vm316_vm0 = vmmov 0   ;;  %v317_v1 = vmov 0.0   ;;  %v42_v2 = vld [vmem:[#allocation5] sm:$0xff] }
  0x27   :  { %207 = vmatprep.subr.bf16.mxu0 %v315_v0  ;;  %204 = vmatprep.mubr.msk.f32.mxu0 %vm316_vm0, %v317_v1  ;;  %v43_v3 = vld [vmem:[#allocation5 + $0x8] sm:$0xff]  ;;  %v44_v5 = vld [vmem:[#allocation5 + $0x10] sm:$0xff]  ;;  %v45_v6 = vld [vmem:[#allocation5 + $0x18] sm:$0xff]  ;;  %s318_s11 = smov [#allocation7]  }
  0x28   :  { %v208_v4 = vpack.c.bf16 %v43_v3, %v42_v2  ;;  %v211_v7 = vpack.c.bf16 %v45_v6, %v44_v5  ;;  %v46_v8 = vld [vmem:[#allocation5 + $0x20] sm:$0xff]  ;;  %v47_v9 = vld [vmem:[#allocation5 + $0x28] sm:$0xff]  ;;  %v48_v11 = vld [vmem:[#allocation5 + $0x30] sm:$0xff]  ;;  %s144_s12 = sshll.u32 %s318_s11, 4  ;;  %s145_s12 = int_to_ptr.vmem [resolvable:$true] %s144_s12 }
  0x29   :  { %v214_v10 = vpack.c.bf16 %v47_v9, %v46_v8  ;;  %v49_v12 = vld [vmem:[#allocation5 + $0x38] sm:$0xff]  ;;  %v50_v14 = vld [vmem:[#allocation5 + $0x40] sm:$0xff]  ;;  %v51_v15 = vld [vmem:[#allocation5 + $0x48] sm:$0xff]  ;;  %s283_s13 = scalar_lea.vmem %s145_s12, 128  ;;  %p288_p3 = scmp.lt.s32.totalorder %s145_s12, %s145_s12 }
  0x2a   :  { %209 = vmatpush3.bf16.xpose.msra.mxu0 %v208_v4  ;;  %v217_v13 = vpack.c.bf16 %v49_v12, %v48_v11  ;;  %v220_v16 = vpack.c.bf16 %v51_v15, %v50_v14  ;;  %v52_v17 = vld [vmem:[#allocation5 + $0x50] sm:$0xff]  ;;  %v53_v18 = vld [vmem:[#allocation5 + $0x58] sm:$0xff]  ;;  %v54_v20 = vld [vmem:[#allocation5 + $0x60] sm:$0xff]  ;;  %p284_p2 = scmp.ne.s32.totalorder %s145_s12, %s283_s13  ;;  %p289_p4 = scmp.lt.s32.totalorder %s283_s13, %s283_s13 }
  0x2b   :  { %210 = vmatprep.subr.bf16.mxu0 %v315_v0  ;;  %v223_v19 = vpack.c.bf16 %v53_v18, %v52_v17  ;;  %v55_v21 = vld [vmem:[#allocation5 + $0x68] sm:$0xff]  ;;  %v56_v23 = vld [vmem:[#allocation5 + $0x70] sm:$0xff]  ;;  %v57_v24 = vld [vmem:[#allocation5 + $0x78] sm:$0xff] }
  0x2c   :  { %v226_v22 = vpack.c.bf16 %v55_v21, %v54_v20  ;;  %v229_v25 = vpack.c.bf16 %v57_v24, %v56_v23  ;;  %v41_v26 = vld [vmem:[#allocation2] sm:$0xff]  ;;  %p290_p5 = por %p289_p4, %p288_p3 }
  0x2d   :  { %v154_v28 = vld [vmem:[%s387_s2] ss:$0 sm:$0xff] }
  0x2e   :  { %p291_p6 = pnand %p290_p5, %p284_p2 }
  0x32   :  { %212 = vmatpush3.bf16.xpose.msra.mxu0 %v211_v7 }
  0x33   :  { %213 = vmatprep.subr.bf16.mxu0 %v315_v0 }
  0x3a   :  { %215 = vmatpush3.bf16.xpose.msra.mxu0 %v214_v10 }
  0x3b   :  { %216 = vmatprep.subr.bf16.mxu0 %v315_v0 }
  0x42   :  { %218 = vmatpush3.bf16.xpose.msra.mxu0 %v217_v13 }
  0x43   :  { %219 = vmatprep.subr.bf16.mxu0 %v315_v0 }
  0x4a   :  { %221 = vmatpush3.bf16.xpose.msra.mxu0 %v220_v16 }
  0x4b   :  { %222 = vmatprep.subr.bf16.mxu0 %v315_v0 }
  0x52   :  { %224 = vmatpush3.bf16.xpose.msra.mxu0 %v223_v19 }
  0x53   :  { %225 = vmatprep.subr.bf16.mxu0 %v315_v0 }
  0x5a   :  { %227 = vmatpush3.bf16.xpose.msra.mxu0 %v226_v22 }
  0x5b   :  { %228 = vmatprep.subr.bf16.mxu0 %v315_v0 }
  0x62   :  { %230 = vmatpush3.bf16.xpose.msra.mxu0 %v229_v25 }
  0x69   :  { %205 = vmatmul.mubr.f32.vlgmr.msra.gmra.mrb[0].mxu0 %v41_v26 }
 0x13c   :  { %v124_v27 = vpop.f32.mrb[0].mxu0 }
 0x13d   :  { %v128_v29 = vmul.f32 0.17677669, %v124_v27  ;;  %v206_v30 = vpop.f32.mrb[1].mxu0 }
 0x13f   :  { %v136_v31 = vadd.f32 %v154_v28, %v128_v29 }
 0x141   :  { %137 = vst [vmem:[#allocation7] sm:$0xff] %v136_v31 }
 0x142   :  { %294 = shalt.err (!%p291_p6)
}
 0x143   :  { %s295_s16 = scalar_lea.hbm %s388_s3, 128 }
 0x144   :  { %p296_p7 = scmp.ne.s32.totalorder %s388_s3, %s295_s16  ;;  %p299_p8 = scmp.lt.u32.totalorder %s295_s16, %s388_s3 }
 0x146   :  { %p301_p9 = pnand %p299_p8, %p296_p7 }
 0x148   :  { %304 = shalt.err (!%p301_p9)
}
 0x149   :  { %147 = dma.vmem_to_hbm [thread:$0]  %s145_s12, 128, %s388_s3, [#allocation4]  }
 0x14a   :  { %309 = dma.done.wait [#allocation4], 128  }
 0x14b   :  { %310 = vsyncadd [#allocation4], 4294967168 }
 0x14c   :  { %151 = vsyncpa [#allocation3], 1 }
 0x14d   :  { %152 = vsyncpa [#allocation6], 1 }
 0x14e   :  { %153 = vsyncpa [#allocation4], 1 }

</bundles_post_ra>
